<compile_context>
chip_gen: v5e
topology: v5e:2x2
jax: 0.10.0
libtpu: 0.0.40
codegen_flags: <defaults>
</compile_context>

<pallas_src>
import functools

import jax
import jax.numpy as jnp
from jax.experimental import pallas as pl
from jax.experimental.pallas import tpu as pltpu


def _round_up(x, m):
    return ((x + m - 1) // m) * m


def _gru_cell_kernel(x_ref, h_ref, hb_ref, wx_ref, wh_ref, b_ref, out_ref, *, th):
    """One (hidden_tile, batch_tile) block of the GRU cell update.

    x_ref  : (TB, Kx)        compute dtype   input x (padded)
    h_ref  : (TB, Hp)        compute dtype   previous hidden state (padded)
    hb_ref : (TB, TH)        float32         h tile for the final blend
    wx_ref : (1, Kx, 3*TH)   compute dtype   [Wx_r^T | Wx_z^T | Wx_n^T] for this tile
    wh_ref : (1, Hp, 3*TH)   compute dtype   [Wh_r^T | Wh_z^T | Wh_n^T] for this tile
    b_ref  : (4, 1, TH)      float32         [b_r_sum, b_z_sum, b_xh_n, b_hh_n]
    out_ref: (TB, TH)
    """
    f32 = jnp.float32

    # MXU: two wide fused matmuls (N = 3*TH), f32 accumulation.
    gx = jnp.dot(x_ref[...], wx_ref[0], preferred_element_type=f32)   # (TB, 3*TH)
    gh = jnp.dot(h_ref[...], wh_ref[0], preferred_element_type=f32)   # (TB, 3*TH)

    # VPU/EUP: gate math in f32 (lane-aligned static slices of the fused result).
    r = jax.nn.sigmoid(gx[:, 0:th] + gh[:, 0:th] + b_ref[0])
    z = jax.nn.sigmoid(gx[:, th:2 * th] + gh[:, th:2 * th] + b_ref[1])
    n = jnp.tanh(gx[:, 2 * th:3 * th] + b_ref[2]
                 + r * (gh[:, 2 * th:3 * th] + b_ref[3]))

    h_prev = hb_ref[...]
    out_ref[...] = (n + z * (h_prev - n)).astype(out_ref.dtype)


def prepare_gru_params(w_xh, b_xh, w_hh, b_hh, *, compute_dtype=jnp.bfloat16,
                       hidden_tile=256):
    """Transpose / fuse / pad the GRUCell parameters once, outside the hot path.

    w_xh: (3H, In), b_xh: (3H,), w_hh: (3H, H), b_hh: (3H,)  (torch Linear layout)

    Weights are stored gate-interleaved-per-hidden-tile so each grid step reads
    a contiguous (K, 3*th) slab and issues a single wide matmul per operand.
    """
    three_h, in_size = w_xh.shape
    hidden = three_h // 3
    hp = _round_up(hidden, 256)            # hidden tile is always >= 256
    kxp = _round_up(in_size, 128)          # lane/sublane-aligned K for x

    # Largest multiple of 256 <= hidden_tile that divides hp (256 always works).
    th = 256
    cand = max(256, (hidden_tile // 256) * 256)
    while cand >= 256:
        if hp % cand == 0:
            th = cand
            break
        cand -= 256
    n_h = hp // th

    wx = w_xh.reshape(3, hidden, in_size)   # (gate, out, in)
    wh = w_hh.reshape(3, hidden, hidden)
    bx = b_xh.reshape(3, hidden)
    bh = b_hh.reshape(3, hidden)

    # Transposed + padded per-gate weights: Wx^T (3, kxp, hp), Wh^T (3, hp, hp)
    wxT = jnp.pad(jnp.transpose(wx, (0, 2, 1)),
                  ((0, 0), (0, kxp - in_size), (0, hp - hidden)))
    whT = jnp.pad(jnp.transpose(wh, (0, 2, 1)),
                  ((0, 0), (0, hp - hidden), (0, hp - hidden)))

    def tileize(wT, K):
        # (3, K, hp) -> (3, K, n_h, th) -> (n_h, K, 3, th) -> (n_h, K, 3*th)
        w4 = wT.reshape(3, K, n_h, th)
        w4 = jnp.transpose(w4, (2, 1, 0, 3))
        return w4.reshape(n_h, K, 3 * th).astype(compute_dtype)

    wx3 = tileize(wxT, kxp)     # (n_h, kxp, 3*th)
    wh3 = tileize(whT, hp)      # (n_h, hp,  3*th)

    # Biases: [b_r_x+b_r_h, b_z_x+b_z_h, b_n_x, b_n_h] -> (4, 1, hp) float32.
    bias = jnp.stack([bx[0] + bh[0], bx[1] + bh[1], bx[2], bh[2]], axis=0)
    bias = jnp.pad(bias, ((0, 0), (0, hp - hidden)))
    bias = bias.reshape(4, 1, hp).astype(jnp.float32)

    return {
        "wx3": wx3, "wh3": wh3, "bias": bias,
        "input_size": in_size, "hidden_size": hidden,
        "hidden_padded": hp, "in_padded": kxp, "hidden_tile": th,
    }


def _vmem_limit_bytes(block_bytes, tb, th):
    """Double-buffered block footprint + headroom, clamped to device VMEM."""
    need = 2 * block_bytes + 8 * tb * th * 4 + (8 << 20)   # temps + margin
    try:
        cap = pltpu.get_tpu_info().vmem_capacity_bytes
    except Exception:
        cap = 64 << 20   # conservative (v7x per-TensorCore)
    return int(max(16 << 20, min(need, int(cap * 0.9))))


def gru_cell_apply(x, h, params, *, batch_tile=256):
    """h' = GRUCell(x, h) using pre-fused parameters (see prepare_gru_params)."""
    in_size = params["input_size"]
    hidden = params["hidden_size"]
    hp = params["hidden_padded"]
    kxp = params["in_padded"]
    th = params["hidden_tile"]
    wx3, wh3, bias = params["wx3"], params["wh3"], params["bias"]
    compute_dtype = wx3.dtype
    c_bytes = jnp.dtype(compute_dtype).itemsize

    batch = x.shape[0]
    assert x.shape[1] == in_size
    if h is None:  # init_hidden: zero state
        h = jnp.zeros((batch, hidden), dtype=x.dtype)

    # Batch tile: sublane granularity (8 for f32 compute, 16 for bf16 packing).
    sub = 8 if c_bytes == 4 else 16
    tb = max(sub, (min(batch_tile, _round_up(batch, sub)) // sub) * sub)
    bp = _round_up(batch, tb)

    # Activation prep (pads/casts are no-ops when shapes/dtypes already match).
    x_c = x.astype(compute_dtype)
    if bp != batch or kxp != in_size:
        x_c = jnp.pad(x_c, ((0, bp - batch), (0, kxp - in_size)))
    h_c = h.astype(compute_dtype)
    h_f32 = h.astype(jnp.float32)
    if bp != batch or hp != hidden:
        h_c = jnp.pad(h_c, ((0, bp - batch), (0, hp - hidden)))
        h_f32 = jnp.pad(h_f32, ((0, bp - batch), (0, hp - hidden)))

    n_h = hp // th
    n_b = bp // tb
    assert wx3.shape == (n_h, kxp, 3 * th) and wh3.shape == (n_h, hp, 3 * th)

    # Grid: hidden tiles OUTER, batch tiles INNER -> weight block indices are
    # constant across the inner loop, so weights cross HBM exactly once.
    grid = (n_h, n_b)

    out_bytes = jnp.dtype(x.dtype).itemsize
    block_bytes = (tb * kxp * c_bytes          # x
                   + tb * hp * c_bytes         # h (compute dtype)
                   + tb * th * 4               # h blend tile (f32)
                   + kxp * 3 * th * c_bytes    # wx3 block
                   + hp * 3 * th * c_bytes     # wh3 block
                   + 4 * th * 4                # bias block
                   + tb * th * out_bytes)      # output block
    vmem_limit = _vmem_limit_bytes(block_bytes, tb, th)

    kernel = functools.partial(_gru_cell_kernel, th=th)

    out = pl.pallas_call(
        kernel,
        out_shape=jax.ShapeDtypeStruct((bp, hp), x.dtype),
        grid=grid,
        in_specs=[
            pl.BlockSpec((tb, kxp), lambda hi, bi: (bi, 0)),          # x
            pl.BlockSpec((tb, hp), lambda hi, bi: (bi, 0)),           # h (compute)
            pl.BlockSpec((tb, th), lambda hi, bi: (bi, hi)),          # h blend (f32)
            pl.BlockSpec((1, kxp, 3 * th), lambda hi, bi: (hi, 0, 0)),  # Wx fused
            pl.BlockSpec((1, hp, 3 * th), lambda hi, bi: (hi, 0, 0)),   # Wh fused
            pl.BlockSpec((4, 1, th), lambda hi, bi: (0, 0, hi)),        # biases
        ],
        out_specs=pl.BlockSpec((tb, th), lambda hi, bi: (bi, hi)),
        compiler_params=pltpu.CompilerParams(
            dimension_semantics=("parallel", "parallel"),
            vmem_limit_bytes=vmem_limit,
        ),
    )(x_c, h_c, h_f32, wx3, wh3, bias)

    return out[:batch, :hidden]


def gru_cell_forward(x, h, w_xh, b_xh, w_hh, b_hh, *, compute_dtype=jnp.bfloat16,
                     batch_tile=256, hidden_tile=256):
    """One-shot convenience wrapper. For repeated calls (e.g. a time-step scan)
    call prepare_gru_params once and reuse gru_cell_apply."""
    params = prepare_gru_params(w_xh, b_xh, w_hh, b_hh,
                                compute_dtype=compute_dtype, hidden_tile=hidden_tile)
    return gru_cell_apply(x, h, params, batch_tile=batch_tile)


def _reference_gru_cell(x, h, w_xh, b_xh, w_hh, b_hh):
    """Pure-JAX reference mirroring the PyTorch forward exactly."""
    hidden = w_hh.shape[1]
    if h is None:
        h = jnp.zeros((x.shape[0], hidden), dtype=x.dtype)
    gate_x = x @ w_xh.T + b_xh
    gate_h = h @ w_hh.T + b_hh
    x_r, x_z, x_n = jnp.split(gate_x, 3, axis=1)
    h_r, h_z, h_n = jnp.split(gate_h, 3, axis=1)
    resetgate = jax.nn.sigmoid(x_r + h_r)
    updategate = jax.nn.sigmoid(x_z + h_z)
    newgate = jnp.tanh(x_n + resetgate * h_n)
    return newgate + updategate * (h - newgate)


if __name__ == "__main__":
    batch = 8
    input_size = 16
    hidden_size = 32

    key = jax.random.PRNGKey(0)
    kx, kh, k1, k2, k3, k4 = jax.random.split(key, 6)

    # reset_parameters(): uniform(-1/sqrt(hidden), +1/sqrt(hidden))
    std = 1.0 / jnp.sqrt(jnp.float32(hidden_size))
    w_xh = jax.random.uniform(k1, (3 * hidden_size, input_size),
                              minval=-std, maxval=std, dtype=jnp.float32)
    b_xh = jax.random.uniform(k2, (3 * hidden_size,),
                              minval=-std, maxval=std, dtype=jnp.float32)
    w_hh = jax.random.uniform(k3, (3 * hidden_size, hidden_size),
                              minval=-std, maxval=std, dtype=jnp.float32)
    b_hh = jax.random.uniform(k4, (3 * hidden_size,),
                              minval=-std, maxval=std, dtype=jnp.float32)

    x = jax.random.normal(kx, (batch, input_size), dtype=jnp.float32)
    h = jax.random.normal(kh, (batch, hidden_size), dtype=jnp.float32)

    ref = _reference_gru_cell(x, h, w_xh, b_xh, w_hh, b_hh)
    ref_none = _reference_gru_cell(x, None, w_xh, b_xh, w_hh, b_hh)

    # f32 compute path (tight check).
    params_f32 = prepare_gru_params(w_xh, b_xh, w_hh, b_hh, compute_dtype=jnp.float32)
    out_f32 = jax.block_until_ready(gru_cell_apply(x, h, params_f32))
    assert out_f32.shape == (batch, hidden_size)
    assert jnp.allclose(out_f32, ref, atol=1e-3, rtol=1e-3)

    # bf16 compute path (recommended: halves weight HBM traffic), looser check.
    params_bf16 = prepare_gru_params(w_xh, b_xh, w_hh, b_hh, compute_dtype=jnp.bfloat16)
    out_bf16 = jax.block_until_ready(gru_cell_apply(x, h, params_bf16))
    assert out_bf16.shape == (batch, hidden_size)
    assert jnp.allclose(out_bf16, ref, atol=5e-2, rtol=5e-2)

    # h=None path (init_hidden -> zeros).
    out_none = jax.block_until_ready(gru_cell_apply(x, None, params_bf16))
    assert jnp.allclose(out_none, ref_none, atol=5e-2, rtol=5e-2)

    print("KERNEL_OK")
</pallas_src>

<mosaic_0001>
module attributes {stable_mosaic.version = 11 : i64} {
  func.func @_gru_cell_kernel(%arg0: i32, %arg1: i32, %arg2: memref<8x128xf32, #tpu.memory_space<vmem>>, %arg3: memref<8x256xf32, #tpu.memory_space<vmem>>, %arg4: memref<8x256xf32, #tpu.memory_space<vmem>>, %arg5: memref<1x128x768xf32, #tpu.memory_space<vmem>>, %arg6: memref<1x256x768xf32, #tpu.memory_space<vmem>>, %arg7: memref<4x1x256xf32, #tpu.memory_space<vmem>>, %arg8: memref<8x256xf32, #tpu.memory_space<vmem>>) attributes {dimension_semantics = [#tpu.dimension_semantics<parallel>, #tpu.dimension_semantics<parallel>], iteration_bounds = array<i64: 1, 1>, scalar_prefetch = 0 : i64, scratch_operands = 0 : i64, tpu.core_type = #tpu.core_type<tc>, window_params = [{transform_indices = @transform_0, window_bounds = array<i64: 8, 128>}, {transform_indices = @transform_1, window_bounds = array<i64: 8, 256>}, {transform_indices = @transform_2, window_bounds = array<i64: 8, 256>}, {transform_indices = @transform_3, window_bounds = array<i64: 1, 128, 768>}, {transform_indices = @transform_4, window_bounds = array<i64: 1, 256, 768>}, {transform_indices = @transform_5, window_bounds = array<i64: 4, 1, 256>}, {transform_indices = @transform_6, window_bounds = array<i64: 8, 256>}]} {
    %c0 = arith.constant 0 : index
    %c0_0 = arith.constant 0 : index
    %0 = vector.load %arg2[%c0, %c0_0] : memref<8x128xf32, #tpu.memory_space<vmem>>, vector<8x128xf32>
    %c0_1 = arith.constant 0 : index
    %c0_2 = arith.constant 0 : index
    %c0_3 = arith.constant 0 : index
    %1 = vector.load %arg5[%c0_1, %c0_2, %c0_3] : memref<1x128x768xf32, #tpu.memory_space<vmem>>, vector<1x128x768xf32>
    %2 = vector.shape_cast %1 : vector<1x128x768xf32> to vector<128x768xf32>
    %cst = arith.constant dense<0.000000e+00> : vector<8x768xf32>
    %3 = tpu.matmul %0, %2, %cst {dimension_numbers = #tpu.dot_dimension_numbers<[1], [0], [0], [1], [0, 0, 1, 1], [], []>} : vector<8x128xf32>, vector<128x768xf32>, vector<8x768xf32> -> vector<8x768xf32>
    %c0_4 = arith.constant 0 : index
    %c0_5 = arith.constant 0 : index
    %4 = vector.load %arg3[%c0_4, %c0_5] : memref<8x256xf32, #tpu.memory_space<vmem>>, vector<8x256xf32>
    %c0_6 = arith.constant 0 : index
    %c0_7 = arith.constant 0 : index
    %c0_8 = arith.constant 0 : index
    %5 = vector.load %arg6[%c0_6, %c0_7, %c0_8] : memref<1x256x768xf32, #tpu.memory_space<vmem>>, vector<1x256x768xf32>
    %6 = vector.shape_cast %5 : vector<1x256x768xf32> to vector<256x768xf32>
    %cst_9 = arith.constant dense<0.000000e+00> : vector<8x768xf32>
    %7 = tpu.matmul %4, %6, %cst_9 {dimension_numbers = #tpu.dot_dimension_numbers<[1], [0], [0], [1], [0, 0, 1, 1], [], []>} : vector<8x256xf32>, vector<256x768xf32>, vector<8x768xf32> -> vector<8x768xf32>
    %8 = vector.extract_strided_slice %3 {offsets = [0, 0], sizes = [8, 256], strides = [1, 1]} : vector<8x768xf32> to vector<8x256xf32>
    %9 = vector.extract_strided_slice %7 {offsets = [0, 0], sizes = [8, 256], strides = [1, 1]} : vector<8x768xf32> to vector<8x256xf32>
    %10 = arith.addf %8, %9 : vector<8x256xf32>
    %c0_10 = arith.constant 0 : index
    %c0_11 = arith.constant 0 : index
    %c0_12 = arith.constant 0 : index
    %11 = vector.load %arg7[%c0_10, %c0_11, %c0_12] : memref<4x1x256xf32, #tpu.memory_space<vmem>>, vector<1x1x256xf32>
    %12 = vector.shape_cast %11 : vector<1x1x256xf32> to vector<1x256xf32>
    %13 = vector.broadcast %12 : vector<1x256xf32> to vector<8x256xf32>
    %14 = arith.addf %10, %13 : vector<8x256xf32>
    %15 = arith.negf %14 : vector<8x256xf32>
    %16 = math.exp %15 : vector<8x256xf32>
    %cst_13 = arith.constant 1.000000e+00 : f32
    %17 = vector.broadcast %cst_13 : f32 to vector<8x256xf32>
    %18 = arith.addf %17, %16 : vector<8x256xf32>
    %19 = arith.divf %17, %18 : vector<8x256xf32>
    %20 = vector.extract_strided_slice %3 {offsets = [0, 256], sizes = [8, 256], strides = [1, 1]} : vector<8x768xf32> to vector<8x256xf32>
    %21 = vector.extract_strided_slice %7 {offsets = [0, 256], sizes = [8, 256], strides = [1, 1]} : vector<8x768xf32> to vector<8x256xf32>
    %22 = arith.addf %20, %21 : vector<8x256xf32>
    %c1 = arith.constant 1 : index
    %c0_14 = arith.constant 0 : index
    %c0_15 = arith.constant 0 : index
    %23 = vector.load %arg7[%c1, %c0_14, %c0_15] : memref<4x1x256xf32, #tpu.memory_space<vmem>>, vector<1x1x256xf32>
    %24 = vector.shape_cast %23 : vector<1x1x256xf32> to vector<1x256xf32>
    %25 = vector.broadcast %24 : vector<1x256xf32> to vector<8x256xf32>
    %26 = arith.addf %22, %25 : vector<8x256xf32>
    %27 = arith.negf %26 : vector<8x256xf32>
    %28 = math.exp %27 : vector<8x256xf32>
    %cst_16 = arith.constant 1.000000e+00 : f32
    %29 = vector.broadcast %cst_16 : f32 to vector<8x256xf32>
    %30 = arith.addf %29, %28 : vector<8x256xf32>
    %31 = arith.divf %29, %30 : vector<8x256xf32>
    %32 = vector.extract_strided_slice %3 {offsets = [0, 512], sizes = [8, 256], strides = [1, 1]} : vector<8x768xf32> to vector<8x256xf32>
    %c2 = arith.constant 2 : index
    %c0_17 = arith.constant 0 : index
    %c0_18 = arith.constant 0 : index
    %33 = vector.load %arg7[%c2, %c0_17, %c0_18] : memref<4x1x256xf32, #tpu.memory_space<vmem>>, vector<1x1x256xf32>
    %34 = vector.shape_cast %33 : vector<1x1x256xf32> to vector<1x256xf32>
    %35 = vector.broadcast %34 : vector<1x256xf32> to vector<8x256xf32>
    %36 = arith.addf %32, %35 : vector<8x256xf32>
    %37 = vector.extract_strided_slice %7 {offsets = [0, 512], sizes = [8, 256], strides = [1, 1]} : vector<8x768xf32> to vector<8x256xf32>
    %c3 = arith.constant 3 : index
    %c0_19 = arith.constant 0 : index
    %c0_20 = arith.constant 0 : index
    %38 = vector.load %arg7[%c3, %c0_19, %c0_20] : memref<4x1x256xf32, #tpu.memory_space<vmem>>, vector<1x1x256xf32>
    %39 = vector.shape_cast %38 : vector<1x1x256xf32> to vector<1x256xf32>
    %40 = vector.broadcast %39 : vector<1x256xf32> to vector<8x256xf32>
    %41 = arith.addf %37, %40 : vector<8x256xf32>
    %42 = arith.mulf %19, %41 : vector<8x256xf32>
    %43 = arith.addf %36, %42 : vector<8x256xf32>
    %44 = math.tanh %43 : vector<8x256xf32>
    %c0_21 = arith.constant 0 : index
    %c0_22 = arith.constant 0 : index
    %45 = vector.load %arg4[%c0_21, %c0_22] : memref<8x256xf32, #tpu.memory_space<vmem>>, vector<8x256xf32>
    %46 = arith.subf %45, %44 : vector<8x256xf32>
    %47 = arith.mulf %31, %46 : vector<8x256xf32>
    %48 = arith.addf %44, %47 : vector<8x256xf32>
    %c0_23 = arith.constant 0 : index
    %c0_24 = arith.constant 0 : index
    %49 = vector.load %arg8[%c0_23, %c0_24] : memref<8x256xf32, #tpu.memory_space<vmem>>, vector<8x256xf32>
    tpu.vector_store %arg8[%c0_23, %c0_24], %48 {strides = array<i32>} : memref<8x256xf32, #tpu.memory_space<vmem>>, vector<8x256xf32>,
    return
  }
  func.func @transform_0(%arg0: i32, %arg1: i32) -> (i32, i32) {
    %c0_i32 = arith.constant 0 : i32
    %c0_i32_0 = arith.constant 0 : i32
    return %arg1, %c0_i32 : i32, i32
  }
  func.func @transform_1(%arg0: i32, %arg1: i32) -> (i32, i32) {
    %c0_i32 = arith.constant 0 : i32
    %c0_i32_0 = arith.constant 0 : i32
    return %arg1, %c0_i32 : i32, i32
  }
  func.func @transform_2(%arg0: i32, %arg1: i32) -> (i32, i32) {
    %c0_i32 = arith.constant 0 : i32
    return %arg1, %arg0 : i32, i32
  }
  func.func @transform_3(%arg0: i32, %arg1: i32) -> (i32, i32, i32) {
    %c0_i32 = arith.constant 0 : i32
    %c0_i32_0 = arith.constant 0 : i32
    %c0_i32_1 = arith.constant 0 : i32
    return %arg0, %c0_i32, %c0_i32_0 : i32, i32, i32
  }
  func.func @transform_4(%arg0: i32, %arg1: i32) -> (i32, i32, i32) {
    %c0_i32 = arith.constant 0 : i32
    %c0_i32_0 = arith.constant 0 : i32
    %c0_i32_1 = arith.constant 0 : i32
    return %arg0, %c0_i32, %c0_i32_0 : i32, i32, i32
  }
  func.func @transform_5(%arg0: i32, %arg1: i32) -> (i32, i32, i32) {
    %c0_i32 = arith.constant 0 : i32
    %c0_i32_0 = arith.constant 0 : i32
    %c0_i32_1 = arith.constant 0 : i32
    return %c0_i32, %c0_i32_0, %arg0 : i32, i32, i32
  }
  func.func @transform_6(%arg0: i32, %arg1: i32) -> (i32, i32) {
    %c0_i32 = arith.constant 0 : i32
    return %arg1, %arg0 : i32, i32
  }
}

</mosaic_0001>

<bundles_post_ra>
// kernel: tpu_custom_call.1
= control target key start
LH: loop header
LB: loop body
LE: loop exit
PB: predicated region body
PF: predicated region fallthrough
CT: control target
= control target key end

     0   :  { %11 = vsyncpa [#allocation3], 0  ;;  %s1239_s0 = inlined_call_operand.hbm [shape: f32[8,128], index: 0, kind: input, shape index: {}]   ;;  %s1240_s1 = inlined_call_operand.hbm [shape: f32[8,256], index: 1, kind: input, shape index: {}]   ;;  %s1241_s2 = inlined_call_operand.hbm [shape: f32[8,256], index: 2, kind: input, shape index: {}]   ;;  %s1242_s3 = inlined_call_operand.hbm [shape: f32[1,128,768], index: 3, kind: input, shape index: {}]   ;;  %s1243_s4 = inlined_call_operand.hbm [shape: f32[1,256,768], index: 4, kind: input, shape index: {}]   ;;  %s1244_s5 = inlined_call_operand.hbm [shape: f32[4,1,256], index: 5, kind: input, shape index: {}]   ;;  %s1245_s6 = inlined_call_operand.hbm [shape: f32[8,256], index: 6, kind: output, shape index: {}]  }
   0x1   :  { %12 = vsyncpa [#allocation6], 0 }
   0x2   :  { %13 = vsyncpa [#allocation9], 0 }
   0x3   :  { %14 = vsyncpa [#allocation12], 0  ;;  %s32_s23 = sshll.u32 %s1240_s1, 4  ;;  %s33_s23 = int_to_ptr.hbm [resolvable:$true] %s32_s23 }
   0x4   :  { %15 = vsyncpa [#allocation4], 0  ;;  %s1127_s24 = smov [#allocation5]   ;;  %s53_s28 = sshll.u32 %s1242_s3, 4  ;;  %s54_s28 = int_to_ptr.hbm [resolvable:$true] %s53_s28 }
   0x5   :  { %s34_s25 = sshll.u32 %s1127_s24, 4  ;;  %s1128_s29 = smov [#allocation8]   ;;  %s35_s25 = int_to_ptr.vmem [resolvable:$true] %s34_s25 }
   0x6   :  { %37 = dma.hbm_to_vmem [thread:$0]  %s33_s23, 256, %s35_s25, [#allocation6]  }
   0x7   :  { %s55_s30 = sshll.u32 %s1128_s29, 4  ;;  %s1129_s7 = smov 768   ;;  %s56_s30 = int_to_ptr.vmem [resolvable:$true] %s55_s30 }
   0x8   :  { %s1130_s8 = smov 48   ;;  %s21_s1 = sshll.u32 %s1239_s0, 4  ;;  %s22_s1 = int_to_ptr.hbm [resolvable:$true] %s21_s1 }
   0x9   :  { %61 = dma.hbm_to_vmem [thread:$0]  %s54_s28, 12288, %s56_s30, [#allocation9], %s1129_s7, %s1129_s7, %s1130_s8  }
   0xa   :  { %s1131_s11 = smov [#allocation2]   ;;  %s43_s3 = sshll.u32 %s1241_s2, 4  ;;  %s44_s3 = int_to_ptr.hbm [resolvable:$true] %s43_s3 }
   0xb   :  { %s23_s12 = sshll.u32 %s1131_s11, 4  ;;  %s1132_s15 = smov [#allocation7]   ;;  %s24_s12 = int_to_ptr.vmem [resolvable:$true] %s23_s12 }
   0xc   :  { %26 = dma.hbm_to_vmem [thread:$0]  %s22_s1, 128, %s24_s12, [#allocation3]  }
   0xd   :  { %s45_s16 = sshll.u32 %s1132_s15, 4  ;;  %s66_s19 = sshll.u32 %s1243_s4, 4  ;;  %s46_s16 = int_to_ptr.vmem [resolvable:$true] %s45_s16  ;;  %s67_s19 = int_to_ptr.hbm [resolvable:$true] %s66_s19 }
   0xe   :  { %48 = dma.hbm_to_vmem [thread:$0]  %s44_s3, 256, %s46_s16, [#allocation6]  }
   0xf   :  { %s79_s21 = sshll.u32 %s1244_s5, 4  ;;  %s1133_s22 = smov [#allocation10]   ;;  %s80_s21 = int_to_ptr.hbm [resolvable:$true] %s79_s21 }
  0x10   :  { %s68_s23 = sshll.u32 %s1133_s22, 4  ;;  %s1134_s2 = smov [#allocation11]   ;;  %s69_s23 = int_to_ptr.vmem [resolvable:$true] %s68_s23 }
  0x11   :  { %74 = dma.hbm_to_vmem [thread:$0]  %s67_s19, 24576, %s69_s23, [#allocation9], %s1129_s7, %s1129_s7, %s1130_s8  }
  0x12   :  { %s81_s24 = sshll.u32 %s1134_s2, 4  ;;  %s1135_s25 = smov 32   ;;  %s82_s24 = int_to_ptr.vmem [resolvable:$true] %s81_s24 }
  0x13   :  { %s1136_s26 = smov 2  }
  0x14   :  { %87 = dma.hbm_to_vmem [thread:$0]  %s80_s21, 128, %s82_s24, [#allocation12], %s1135_s25, %s1135_s25, %s1136_s26  }
  0x15   :  { %1117 = dma.done.wait [#allocation3], 128  }
  0x16   :  { %1118 = vsyncadd [#allocation3], 4294967168 }
  0x17   :  { %1119 = dma.done.wait [#allocation6], 512  }
  0x18   :  { %1120 = vsyncadd [#allocation6], 4294966784 }
  0x19   :  { %1121 = dma.done.wait [#allocation9], 36864  }
  0x1a   :  { %1122 = vsyncadd [#allocation9], 4294930432 }
  0x1b   :  { %1123 = dma.done.wait [#allocation12], 128  }
  0x1c   :  { %1124 = vsyncadd [#allocation12], 4294967168  ;;  %v203_v0 = vld [vmem:[#allocation8 + $0x2d0] sm:$0xff]  ;;  %v204_v1 = vld [vmem:[#allocation8 + $0x2d8] sm:$0xff]  ;;  %s1137_s4 = smov [#allocation13]   ;;  %s901_s29 = sshll.u32 %s1245_s6, 4  ;;  %s902_s29 = int_to_ptr.hbm [resolvable:$true] %s901_s29 }
  0x1d   :  { %v205_v2 = vld [vmem:[#allocation8 + $0x2e0] sm:$0xff]  ;;  %209 = vmatpush.msra.mxu0 %v203_v0  ;;  %229 = vmatpush.msra.mxu1 %v204_v1  ;;  %v206_v3 = vld [vmem:[#allocation8 + $0x2e8] sm:$0xff]  ;;  %v199_v6 = vld [vmem:[#allocation8 + $0x2b0] sm:$0xff]  ;;  %s899_s5 = sshll.u32 %s1137_s4, 4  ;;  %s900_s5 = int_to_ptr.vmem [resolvable:$true] %s899_s5 }
  0x1e   :  { %v197_v4 = vld [vmem:[#allocation8 + $0x2a0] sm:$0xff]  ;;  %v198_v5 = vld [vmem:[#allocation8 + $0x2a8] sm:$0xff]  ;;  %249 = vmatpush.msra.mxu2 %v205_v2  ;;  %269 = vmatpush.msra.mxu3 %v206_v3  ;;  %v200_v7 = vld [vmem:[#allocation8 + $0x2b8] sm:$0xff] }
  0x1f   :  { %v191_v8 = vld [vmem:[#allocation8 + $0x270] sm:$0xff]  ;;  %210 = vmatpush.msra.mxu0 %v197_v4  ;;  %230 = vmatpush.msra.mxu1 %v198_v5  ;;  %v192_v9 = vld [vmem:[#allocation8 + $0x278] sm:$0xff]  ;;  %v193_v10 = vld [vmem:[#allocation8 + $0x280] sm:$0xff] }
  0x20   :  { %v194_v11 = vld [vmem:[#allocation8 + $0x288] sm:$0xff]  ;;  %250 = vmatpush.msra.mxu2 %v199_v6  ;;  %270 = vmatpush.msra.mxu3 %v200_v7  ;;  %v185_v12 = vld [vmem:[#allocation8 + $0x240] sm:$0xff]  ;;  %v187_v14 = vld [vmem:[#allocation8 + $0x250] sm:$0xff] }
  0x21   :  { %v186_v13 = vld [vmem:[#allocation8 + $0x248] sm:$0xff]  ;;  %211 = vmatpush.msra.mxu0 %v191_v8  ;;  %231 = vmatpush.msra.mxu1 %v192_v9  ;;  %v188_v15 = vld [vmem:[#allocation8 + $0x258] sm:$0xff]  ;;  %v179_v16 = vld [vmem:[#allocation8 + $0x210] sm:$0xff] }
  0x22   :  { %251 = vmatpush.msra.mxu2 %v193_v10  ;;  %271 = vmatpush.msra.mxu3 %v194_v11  ;;  %v180_v17 = vld [vmem:[#allocation8 + $0x218] sm:$0xff]  ;;  %v181_v18 = vld [vmem:[#allocation8 + $0x220] sm:$0xff]  ;;  %v182_v19 = vld [vmem:[#allocation8 + $0x228] sm:$0xff] }
  0x23   :  { %212 = vmatpush.msra.mxu0 %v185_v12  ;;  %232 = vmatpush.msra.mxu1 %v186_v13  ;;  %v173_v20 = vld [vmem:[#allocation8 + $0x1e0] sm:$0xff]  ;;  %v174_v21 = vld [vmem:[#allocation8 + $0x1e8] sm:$0xff]  ;;  %v175_v22 = vld [vmem:[#allocation8 + $0x1f0] sm:$0xff] }
  0x24   :  { %252 = vmatpush.msra.mxu2 %v187_v14  ;;  %272 = vmatpush.msra.mxu3 %v188_v15  ;;  %v176_v23 = vld [vmem:[#allocation8 + $0x1f8] sm:$0xff]  ;;  %v167_v24 = vld [vmem:[#allocation8 + $0x1b0] sm:$0xff]  ;;  %v169_v26 = vld [vmem:[#allocation8 + $0x1c0] sm:$0xff] }
  0x25   :  { %213 = vmatpush.msra.mxu0 %v179_v16  ;;  %233 = vmatpush.msra.mxu1 %v180_v17  ;;  %v168_v25 = vld [vmem:[#allocation8 + $0x1b8] sm:$0xff]  ;;  %v170_v27 = vld [vmem:[#allocation8 + $0x1c8] sm:$0xff]  ;;  %v161_v28 = vld [vmem:[#allocation8 + $0x180] sm:$0xff] }
  0x26   :  { %253 = vmatpush.msra.mxu2 %v181_v18  ;;  %273 = vmatpush.msra.mxu3 %v182_v19  ;;  %v162_v29 = vld [vmem:[#allocation8 + $0x188] sm:$0xff]  ;;  %v163_v30 = vld [vmem:[#allocation8 + $0x190] sm:$0xff]  ;;  %v164_v31 = vld [vmem:[#allocation8 + $0x198] sm:$0xff] }
  0x27   :  { %214 = vmatpush.msra.mxu0 %v173_v20  ;;  %234 = vmatpush.msra.mxu1 %v174_v21  ;;  %v155_v32 = vld [vmem:[#allocation8 + $0x150] sm:$0xff]  ;;  %v156_v33 = vld [vmem:[#allocation8 + $0x158] sm:$0xff]  ;;  %v157_v34 = vld [vmem:[#allocation8 + $0x160] sm:$0xff] }
  0x28   :  { %254 = vmatpush.msra.mxu2 %v175_v22  ;;  %274 = vmatpush.msra.mxu3 %v176_v23  ;;  %v158_v35 = vld [vmem:[#allocation8 + $0x168] sm:$0xff]  ;;  %v149_v36 = vld [vmem:[#allocation8 + $0x120] sm:$0xff]  ;;  %v151_v38 = vld [vmem:[#allocation8 + $0x130] sm:$0xff] }
  0x29   :  { %215 = vmatpush.msra.mxu0 %v167_v24  ;;  %235 = vmatpush.msra.mxu1 %v168_v25  ;;  %v150_v37 = vld [vmem:[#allocation8 + $0x128] sm:$0xff]  ;;  %v152_v39 = vld [vmem:[#allocation8 + $0x138] sm:$0xff]  ;;  %v143_v40 = vld [vmem:[#allocation8 + $0xf0] sm:$0xff] }
  0x2a   :  { %255 = vmatpush.msra.mxu2 %v169_v26  ;;  %275 = vmatpush.msra.mxu3 %v170_v27  ;;  %v144_v41 = vld [vmem:[#allocation8 + $0xf8] sm:$0xff]  ;;  %v145_v42 = vld [vmem:[#allocation8 + $0x100] sm:$0xff]  ;;  %v146_v43 = vld [vmem:[#allocation8 + $0x108] sm:$0xff] }
  0x2b   :  { %216 = vmatpush.msra.mxu0 %v161_v28  ;;  %236 = vmatpush.msra.mxu1 %v162_v29  ;;  %v137_v44 = vld [vmem:[#allocation8 + $0xc0] sm:$0xff]  ;;  %v138_v45 = vld [vmem:[#allocation8 + $0xc8] sm:$0xff]  ;;  %v139_v46 = vld [vmem:[#allocation8 + $0xd0] sm:$0xff] }
  0x2c   :  { %256 = vmatpush.msra.mxu2 %v163_v30  ;;  %276 = vmatpush.msra.mxu3 %v164_v31  ;;  %v140_v47 = vld [vmem:[#allocation8 + $0xd8] sm:$0xff]  ;;  %v131_v48 = vld [vmem:[#allocation8 + $0x90] sm:$0xff]  ;;  %v133_v50 = vld [vmem:[#allocation8 + $0xa0] sm:$0xff] }
  0x2d   :  { %217 = vmatpush.msra.mxu0 %v155_v32  ;;  %237 = vmatpush.msra.mxu1 %v156_v33  ;;  %v132_v49 = vld [vmem:[#allocation8 + $0x98] sm:$0xff]  ;;  %v134_v51 = vld [vmem:[#allocation8 + $0xa8] sm:$0xff]  ;;  %v125_v52 = vld [vmem:[#allocation8 + $0x60] sm:$0xff] }
  0x2e   :  { %257 = vmatpush.msra.mxu2 %v157_v34  ;;  %277 = vmatpush.msra.mxu3 %v158_v35  ;;  %v126_v53 = vld [vmem:[#allocation8 + $0x68] sm:$0xff]  ;;  %v127_v54 = vld [vmem:[#allocation8 + $0x70] sm:$0xff]  ;;  %v128_v55 = vld [vmem:[#allocation8 + $0x78] sm:$0xff] }
  0x2f   :  { %218 = vmatpush.msra.mxu0 %v149_v36  ;;  %238 = vmatpush.msra.mxu1 %v150_v37  ;;  %v119_v56 = vld [vmem:[#allocation8 + $0x30] sm:$0xff]  ;;  %v120_v57 = vld [vmem:[#allocation8 + $0x38] sm:$0xff]  ;;  %v121_v58 = vld [vmem:[#allocation8 + $0x40] sm:$0xff] }
  0x30   :  { %258 = vmatpush.msra.mxu2 %v151_v38  ;;  %278 = vmatpush.msra.mxu3 %v152_v39  ;;  %v122_v59 = vld [vmem:[#allocation8 + $0x48] sm:$0xff]  ;;  %v113_v60 = vld [vmem:[#allocation8] sm:$0xff]  ;;  %v115_v62 = vld [vmem:[#allocation8 + $0x10] sm:$0xff] }
  0x31   :  { %219 = vmatpush.msra.mxu0 %v143_v40  ;;  %239 = vmatpush.msra.mxu1 %v144_v41  ;;  %v114_v61 = vld [vmem:[#allocation8 + $0x8] sm:$0xff]  ;;  %v116_v63 = vld [vmem:[#allocation8 + $0x18] sm:$0xff]  ;;  %v207_v0 = vld [vmem:[#allocation8 + $0x2f0] sm:$0xff] }
  0x32   :  { %259 = vmatpush.msra.mxu2 %v145_v42  ;;  %279 = vmatpush.msra.mxu3 %v146_v43  ;;  %v208_v1 = vld [vmem:[#allocation8 + $0x2f8] sm:$0xff]  ;;  %v421_v2 = vld [vmem:[#allocation10 + $0x2d0] sm:$0xff]  ;;  %v201_v4 = vld [vmem:[#allocation8 + $0x2c0] sm:$0xff] }
  0x33   :  { %220 = vmatpush.msra.mxu0 %v137_v44  ;;  %240 = vmatpush.msra.mxu1 %v138_v45  ;;  %v517_v3 = vld [vmem:[#allocation10 + $0x5d0] sm:$0xff]  ;;  %v202_v5 = vld [vmem:[#allocation8 + $0x2c8] sm:$0xff]  ;;  %v415_v6 = vld [vmem:[#allocation10 + $0x2a0] sm:$0xff] }
  0x34   :  { %260 = vmatpush.msra.mxu2 %v139_v46  ;;  %280 = vmatpush.msra.mxu3 %v140_v47  ;;  %v511_v7 = vld [vmem:[#allocation10 + $0x5a0] sm:$0xff]  ;;  %v195_v8 = vld [vmem:[#allocation8 + $0x290] sm:$0xff]  ;;  %v196_v9 = vld [vmem:[#allocation8 + $0x298] sm:$0xff] }
  0x35   :  { %221 = vmatpush.msra.mxu0 %v131_v48  ;;  %241 = vmatpush.msra.mxu1 %v132_v49  ;;  %v409_v10 = vld [vmem:[#allocation10 + $0x270] sm:$0xff]  ;;  %v189_v12 = vld [vmem:[#allocation8 + $0x260] sm:$0xff]  ;;  %v190_v13 = vld [vmem:[#allocation8 + $0x268] sm:$0xff] }
  0x36   :  { %261 = vmatpush.msra.mxu2 %v133_v50  ;;  %281 = vmatpush.msra.mxu3 %v134_v51  ;;  %v505_v11 = vld [vmem:[#allocation10 + $0x570] sm:$0xff]  ;;  %v403_v14 = vld [vmem:[#allocation10 + $0x240] sm:$0xff]  ;;  %v184_v17 = vld [vmem:[#allocation8 + $0x238] sm:$0xff] }
  0x37   :  { %222 = vmatpush.msra.mxu0 %v125_v52  ;;  %242 = vmatpush.msra.mxu1 %v126_v53  ;;  %v499_v15 = vld [vmem:[#allocation10 + $0x540] sm:$0xff]  ;;  %v183_v16 = vld [vmem:[#allocation8 + $0x230] sm:$0xff]  ;;  %v178_v21 = vld [vmem:[#allocation8 + $0x208] sm:$0xff] }
  0x38   :  { %262 = vmatpush.msra.mxu2 %v127_v54  ;;  %282 = vmatpush.msra.mxu3 %v128_v55  ;;  %v397_v18 = vld [vmem:[#allocation10 + $0x210] sm:$0xff]  ;;  %v177_v20 = vld [vmem:[#allocation8 + $0x200] sm:$0xff]  ;;  %v172_v25 = vld [vmem:[#allocation8 + $0x1d8] sm:$0xff] }
  0x39   :  { %223 = vmatpush.msra.mxu0 %v119_v56  ;;  %243 = vmatpush.msra.mxu1 %v120_v57  ;;  %v493_v19 = vld [vmem:[#allocation10 + $0x510] sm:$0xff]  ;;  %v391_v22 = vld [vmem:[#allocation10 + $0x1e0] sm:$0xff]  ;;  %v166_v29 = vld [vmem:[#allocation8 + $0x1a8] sm:$0xff] }
  0x3a   :  { %263 = vmatpush.msra.mxu2 %v121_v58  ;;  %283 = vmatpush.msra.mxu3 %v122_v59  ;;  %v487_v23 = vld [vmem:[#allocation10 + $0x4e0] sm:$0xff]  ;;  %v171_v24 = vld [vmem:[#allocation8 + $0x1d0] sm:$0xff]  ;;  %v160_v33 = vld [vmem:[#allocation8 + $0x178] sm:$0xff] }
  0x3b   :  { %224 = vmatpush.msra.mxu0 %v113_v60  ;;  %244 = vmatpush.msra.mxu1 %v114_v61  ;;  %v385_v26 = vld [vmem:[#allocation10 + $0x1b0] sm:$0xff]  ;;  %v165_v28 = vld [vmem:[#allocation8 + $0x1a0] sm:$0xff]  ;;  %v154_v37 = vld [vmem:[#allocation8 + $0x148] sm:$0xff] }
  0x3c   :  { %264 = vmatpush.msra.mxu2 %v115_v62  ;;  %284 = vmatpush.msra.mxu3 %v116_v63  ;;  %v481_v27 = vld [vmem:[#allocation10 + $0x4b0] sm:$0xff]  ;;  %v379_v30 = vld [vmem:[#allocation10 + $0x180] sm:$0xff]  ;;  %v148_v41 = vld [vmem:[#allocation8 + $0x118] sm:$0xff] }
  0x3d   :  { %289 = vmatpush.msrb.mxu0 %v207_v0  ;;  %309 = vmatpush.msrb.mxu1 %v208_v1  ;;  %v475_v31 = vld [vmem:[#allocation10 + $0x480] sm:$0xff]  ;;  %v159_v32 = vld [vmem:[#allocation8 + $0x170] sm:$0xff]  ;;  %v142_v45 = vld [vmem:[#allocation8 + $0xe8] sm:$0xff] }
  0x3e   :  { %523 = vmatpush.msrb.mxu2 %v421_v2  ;;  %543 = vmatpush.msrb.mxu3 %v517_v3  ;;  %v373_v34 = vld [vmem:[#allocation10 + $0x150] sm:$0xff]  ;;  %v153_v36 = vld [vmem:[#allocation8 + $0x140] sm:$0xff]  ;;  %v1191_v48 = vld [vmem:[#allocation2] sm:$0xff] }
  0x3f   :  { %290 = vmatpush.msrb.mxu0 %v201_v4  ;;  %310 = vmatpush.msrb.mxu1 %v202_v5  ;;  %v469_v35 = vld [vmem:[#allocation10 + $0x450] sm:$0xff]  ;;  %v367_v38 = vld [vmem:[#allocation10 + $0x120] sm:$0xff]  ;;  %v136_v50 = vld [vmem:[#allocation8 + $0xb8] sm:$0xff] }
  0x40   :  { %524 = vmatpush.msrb.mxu2 %v415_v6  ;;  %544 = vmatpush.msrb.mxu3 %v511_v7  ;;  %v463_v39 = vld [vmem:[#allocation10 + $0x420] sm:$0xff]  ;;  %v147_v40 = vld [vmem:[#allocation8 + $0x110] sm:$0xff]  ;;  %v130_v54 = vld [vmem:[#allocation8 + $0x88] sm:$0xff] }
  0x41   :  { %291 = vmatpush.msrb.mxu0 %v195_v8  ;;  %311 = vmatpush.msrb.mxu1 %v196_v9  ;;  %v361_v42 = vld [vmem:[#allocation10 + $0xf0] sm:$0xff]  ;;  %v141_v44 = vld [vmem:[#allocation8 + $0xe0] sm:$0xff]  ;;  %v124_v58 = vld [vmem:[#allocation8 + $0x58] sm:$0xff] }
  0x42   :  { %525 = vmatpush.msrb.mxu2 %v409_v10  ;;  %545 = vmatpush.msrb.mxu3 %v505_v11  ;;  %v457_v43 = vld [vmem:[#allocation10 + $0x3f0] sm:$0xff]  ;;  %v355_v46 = vld [vmem:[#allocation10 + $0xc0] sm:$0xff]  ;;  %v118_v62 = vld [vmem:[#allocation8 + $0x28] sm:$0xff] }
  0x43   :  { %292 = vmatpush.msrb.mxu0 %v189_v12  ;;  %312 = vmatpush.msrb.mxu1 %v190_v13  ;;  %v451_v47 = vld [vmem:[#allocation10 + $0x3c0] sm:$0xff]  ;;  %v135_v49 = vld [vmem:[#allocation8 + $0xb0] sm:$0xff]  ;;  %v1197_v2 = vld [vmem:[#allocation5 + $0x8] sm:$0xff] }
  0x44   :  { %526 = vmatpush.msrb.mxu2 %v403_v14  ;;  %546 = vmatpush.msrb.mxu3 %v499_v15  ;;  %v349_v51 = vld [vmem:[#allocation10 + $0x90] sm:$0xff]  ;;  %v129_v53 = vld [vmem:[#allocation8 + $0x80] sm:$0xff]  ;;  %v422_v3 = vld [vmem:[#allocation10 + $0x2d8] sm:$0xff] }
  0x45   :  { %293 = vmatpush.msrb.mxu0 %v183_v16  ;;  %313 = vmatpush.msrb.mxu1 %v184_v17  ;;  %v445_v52 = vld [vmem:[#allocation10 + $0x390] sm:$0xff]  ;;  %v343_v55 = vld [vmem:[#allocation10 + $0x60] sm:$0xff]  ;;  %v518_v4 = vld [vmem:[#allocation10 + $0x5d8] sm:$0xff] }
  0x46   :  { %527 = vmatpush.msrb.mxu2 %v397_v18  ;;  %547 = vmatpush.msrb.mxu3 %v493_v19  ;;  %v439_v56 = vld [vmem:[#allocation10 + $0x360] sm:$0xff]  ;;  %v123_v57 = vld [vmem:[#allocation8 + $0x50] sm:$0xff]  ;;  %v416_v7 = vld [vmem:[#allocation10 + $0x2a8] sm:$0xff] }
  0x47   :  { %294 = vmatpush.msrb.mxu0 %v177_v20  ;;  %314 = vmatpush.msrb.mxu1 %v178_v21  ;;  %v337_v59 = vld [vmem:[#allocation10 + $0x30] sm:$0xff]  ;;  %v117_v61 = vld [vmem:[#allocation8 + $0x20] sm:$0xff]  ;;  %v512_v8 = vld [vmem:[#allocation10 + $0x5a8] sm:$0xff] }
  0x48   :  { %528 = vmatpush.msrb.mxu2 %v391_v22  ;;  %548 = vmatpush.msrb.mxu3 %v487_v23  ;;  %v433_v60 = vld [vmem:[#allocation10 + $0x330] sm:$0xff]  ;;  %v331_v63 = vld [vmem:[#allocation10] sm:$0xff]  ;;  %v410_v11 = vld [vmem:[#allocation10 + $0x278] sm:$0xff] }
  0x49   :  { %295 = vmatpush.msrb.mxu0 %v171_v24  ;;  %315 = vmatpush.msrb.mxu1 %v172_v25  ;;  %v427_v0 = vld [vmem:[#allocation10 + $0x300] sm:$0xff]  ;;  %v417_v9 = vld [vmem:[#allocation10 + $0x2b0] sm:$0xff]  ;;  %v506_v12 = vld [vmem:[#allocation10 + $0x578] sm:$0xff] }
  0x4a   :  { %529 = vmatpush.msrb.mxu2 %v385_v26  ;;  %549 = vmatpush.msrb.mxu3 %v481_v27  ;;  %v1195_v1 = vld [vmem:[#allocation5] sm:$0xff]  ;;  %v513_v10 = vld [vmem:[#allocation10 + $0x5b0] sm:$0xff]  ;;  %v404_v15 = vld [vmem:[#allocation10 + $0x248] sm:$0xff] }
  0x4b   :  { %296 = vmatpush.msrb.mxu0 %v165_v28  ;;  %316 = vmatpush.msrb.mxu1 %v166_v29  ;;  %v423_v5 = vld [vmem:[#allocation10 + $0x2e0] sm:$0xff]  ;;  %v500_v16 = vld [vmem:[#allocation10 + $0x548] sm:$0xff]  ;;  %v405_v17 = vld [vmem:[#allocation10 + $0x250] sm:$0xff] }
  0x4c   :  { %530 = vmatpush.msrb.mxu2 %v379_v30  ;;  %550 = vmatpush.msrb.mxu3 %v475_v31  ;;  %v519_v6 = vld [vmem:[#allocation10 + $0x5e0] sm:$0xff]  ;;  %v501_v18 = vld [vmem:[#allocation10 + $0x550] sm:$0xff]  ;;  %v398_v19 = vld [vmem:[#allocation10 + $0x218] sm:$0xff] }
  0x4d   :  { %297 = vmatpush.msrb.mxu0 %v159_v32  ;;  %317 = vmatpush.msrb.mxu1 %v160_v33  ;;  %v411_v13 = vld [vmem:[#allocation10 + $0x280] sm:$0xff]  ;;  %v494_v20 = vld [vmem:[#allocation10 + $0x518] sm:$0xff]  ;;  %v392_v23 = vld [vmem:[#allocation10 + $0x1e8] sm:$0xff] }
  0x4e   :  { %531 = vmatpush.msrb.mxu2 %v373_v34  ;;  %551 = vmatpush.msrb.mxu3 %v469_v35  ;;  %v507_v14 = vld [vmem:[#allocation10 + $0x580] sm:$0xff]  ;;  %v488_v24 = vld [vmem:[#allocation10 + $0x4e8] sm:$0xff]  ;;  %v393_v25 = vld [vmem:[#allocation10 + $0x1f0] sm:$0xff] }
  0x4f   :  { %298 = vmatpush.msrb.mxu0 %v153_v36  ;;  %318 = vmatpush.msrb.mxu1 %v154_v37  ;;  %v399_v21 = vld [vmem:[#allocation10 + $0x220] sm:$0xff]  ;;  %v489_v26 = vld [vmem:[#allocation10 + $0x4f0] sm:$0xff]  ;;  %v386_v27 = vld [vmem:[#allocation10 + $0x1b8] sm:$0xff] }
  0x50   :  { %532 = vmatpush.msrb.mxu2 %v367_v38  ;;  %552 = vmatpush.msrb.mxu3 %v463_v39  ;;  %v495_v22 = vld [vmem:[#allocation10 + $0x520] sm:$0xff]  ;;  %v482_v28 = vld [vmem:[#allocation10 + $0x4b8] sm:$0xff]  ;;  %v380_v31 = vld [vmem:[#allocation10 + $0x188] sm:$0xff] }
  0x51   :  { %299 = vmatpush.msrb.mxu0 %v147_v40  ;;  %319 = vmatpush.msrb.mxu1 %v148_v41  ;;  %v387_v29 = vld [vmem:[#allocation10 + $0x1c0] sm:$0xff]  ;;  %v476_v32 = vld [vmem:[#allocation10 + $0x488] sm:$0xff]  ;;  %v381_v33 = vld [vmem:[#allocation10 + $0x190] sm:$0xff] }
  0x52   :  { %533 = vmatpush.msrb.mxu2 %v361_v42  ;;  %553 = vmatpush.msrb.mxu3 %v457_v43  ;;  %v483_v30 = vld [vmem:[#allocation10 + $0x4c0] sm:$0xff]  ;;  %v477_v34 = vld [vmem:[#allocation10 + $0x490] sm:$0xff]  ;;  %v374_v35 = vld [vmem:[#allocation10 + $0x158] sm:$0xff] }
  0x53   :  { %300 = vmatpush.msrb.mxu0 %v141_v44  ;;  %320 = vmatpush.msrb.mxu1 %v142_v45  ;;  %v470_v36 = vld [vmem:[#allocation10 + $0x458] sm:$0xff]  ;;  %v375_v37 = vld [vmem:[#allocation10 + $0x160] sm:$0xff]  ;;  %v368_v39 = vld [vmem:[#allocation10 + $0x128] sm:$0xff] }
  0x54   :  { %534 = vmatpush.msrb.mxu2 %v355_v46  ;;  %554 = vmatpush.msrb.mxu3 %v451_v47  ;;  %v471_v38 = vld [vmem:[#allocation10 + $0x460] sm:$0xff]  ;;  %v464_v40 = vld [vmem:[#allocation10 + $0x428] sm:$0xff]  ;;  %v369_v41 = vld [vmem:[#allocation10 + $0x130] sm:$0xff] }
  0x55   :  { %265 = vmatmul.f32.vlgmr.msra.gmra.mxu2 %v1191_v48  ;;  %285 = vmatmul.f32.vlgmr.msra.gmra.mxu3 %v1191_v48  ;;  %v465_v42 = vld [vmem:[#allocation10 + $0x430] sm:$0xff]  ;;  %v362_v43 = vld [vmem:[#allocation10 + $0xf8] sm:$0xff]  ;;  %v363_v45 = vld [vmem:[#allocation10 + $0x100] sm:$0xff] }
  0x56   :  { %301 = vmatpush.msrb.mxu0 %v135_v49  ;;  %321 = vmatpush.msrb.mxu1 %v136_v50  ;;  %v458_v44 = vld [vmem:[#allocation10 + $0x3f8] sm:$0xff]  ;;  %v459_v46 = vld [vmem:[#allocation10 + $0x400] sm:$0xff]  ;;  %v356_v47 = vld [vmem:[#allocation10 + $0xc8] sm:$0xff] }
  0x57   :  { %535 = vmatpush.msrb.mxu2 %v349_v51  ;;  %555 = vmatpush.msrb.mxu3 %v445_v52  ;;  %v452_v49 = vld [vmem:[#allocation10 + $0x3c8] sm:$0xff]  ;;  %v357_v50 = vld [vmem:[#allocation10 + $0xd0] sm:$0xff]  ;;  %v350_v52 = vld [vmem:[#allocation10 + $0x98] sm:$0xff] }
  0x58   :  { %302 = vmatpush.msrb.mxu0 %v129_v53  ;;  %322 = vmatpush.msrb.mxu1 %v130_v54  ;;  %v453_v51 = vld [vmem:[#allocation10 + $0x3d0] sm:$0xff]  ;;  %v446_v53 = vld [vmem:[#allocation10 + $0x398] sm:$0xff]  ;;  %v351_v54 = vld [vmem:[#allocation10 + $0xa0] sm:$0xff] }
  0x59   :  { %536 = vmatpush.msrb.mxu2 %v343_v55  ;;  %556 = vmatpush.msrb.mxu3 %v439_v56  ;;  %v447_v55 = vld [vmem:[#allocation10 + $0x3a0] sm:$0xff]  ;;  %v344_v56 = vld [vmem:[#allocation10 + $0x68] sm:$0xff] }
  0x5a   :  { %303 = vmatpush.msrb.mxu0 %v123_v57  ;;  %323 = vmatpush.msrb.mxu1 %v124_v58  ;;  %v440_v57 = vld [vmem:[#allocation10 + $0x368] sm:$0xff]  ;;  %v345_v58 = vld [vmem:[#allocation10 + $0x70] sm:$0xff] }
  0x5b   :  { %537 = vmatpush.msrb.mxu2 %v337_v59  ;;  %557 = vmatpush.msrb.mxu3 %v433_v60  ;;  %v441_v59 = vld [vmem:[#allocation10 + $0x370] sm:$0xff]  ;;  %v338_v60 = vld [vmem:[#allocation10 + $0x38] sm:$0xff] }
  0x5c   :  { %304 = vmatpush.msrb.mxu0 %v117_v61  ;;  %324 = vmatpush.msrb.mxu1 %v118_v62  ;;  %v434_v61 = vld [vmem:[#allocation10 + $0x338] sm:$0xff]  ;;  %v339_v62 = vld [vmem:[#allocation10 + $0x40] sm:$0xff] }
  0x5d   :  { %538 = vmatpush.msrb.mxu2 %v331_v63  ;;  %558 = vmatpush.msrb.mxu3 %v427_v0  ;;  %v435_v63 = vld [vmem:[#allocation10 + $0x340] sm:$0xff]  ;;  %v332_v0 = vld [vmem:[#allocation10 + $0x8] sm:$0xff] }
  0x5e   :  { %225 = vmatmul.f32.vlgmr.msra.gmra.mxu0 %v1191_v48  ;;  %245 = vmatmul.f32.vlgmr.msra.gmra.mxu1 %v1191_v48 }
  0x5f   :  { %539 = vmatmul.f32.vlgmr.msrb.gmra.mxu2 %v1195_v1  ;;  %559 = vmatmul.f32.vlgmr.msrb.gmra.mxu3 %v1197_v2 }
  0x60   :  { %563 = vmatpush.msra.mxu0 %v422_v3  ;;  %583 = vmatpush.msra.mxu1 %v518_v4  ;;  %v428_v3 = vld [vmem:[#allocation10 + $0x308] sm:$0xff]  ;;  %v429_v4 = vld [vmem:[#allocation10 + $0x310] sm:$0xff] }
  0x61   :  { %603 = vmatpush.msra.mxu2 %v423_v5  ;;  %623 = vmatpush.msra.mxu3 %v519_v6  ;;  %v424_v5 = vld [vmem:[#allocation10 + $0x2e8] sm:$0xff] }
  0x62   :  { %564 = vmatpush.msra.mxu0 %v416_v7  ;;  %584 = vmatpush.msra.mxu1 %v512_v8  ;;  %v520_v6 = vld [vmem:[#allocation10 + $0x5e8] sm:$0xff]  ;;  %v425_v7 = vld [vmem:[#allocation10 + $0x2f0] sm:$0xff] }
  0x63   :  { %604 = vmatpush.msra.mxu2 %v417_v9  ;;  %624 = vmatpush.msra.mxu3 %v513_v10  ;;  %v521_v8 = vld [vmem:[#allocation10 + $0x5f0] sm:$0xff]  ;;  %v418_v9 = vld [vmem:[#allocation10 + $0x2b8] sm:$0xff] }
  0x64   :  { %565 = vmatpush.msra.mxu0 %v410_v11  ;;  %585 = vmatpush.msra.mxu1 %v506_v12  ;;  %v514_v10 = vld [vmem:[#allocation10 + $0x5b8] sm:$0xff]  ;;  %v419_v11 = vld [vmem:[#allocation10 + $0x2c0] sm:$0xff] }
  0x65   :  { %605 = vmatpush.msra.mxu2 %v411_v13  ;;  %625 = vmatpush.msra.mxu3 %v507_v14  ;;  %v515_v12 = vld [vmem:[#allocation10 + $0x5c0] sm:$0xff]  ;;  %v412_v13 = vld [vmem:[#allocation10 + $0x288] sm:$0xff] }
  0x66   :  { %566 = vmatpush.msra.mxu0 %v404_v15  ;;  %586 = vmatpush.msra.mxu1 %v500_v16  ;;  %v508_v14 = vld [vmem:[#allocation10 + $0x588] sm:$0xff]  ;;  %v413_v15 = vld [vmem:[#allocation10 + $0x290] sm:$0xff] }
  0x67   :  { %606 = vmatpush.msra.mxu2 %v405_v17  ;;  %626 = vmatpush.msra.mxu3 %v501_v18  ;;  %v509_v16 = vld [vmem:[#allocation10 + $0x590] sm:$0xff]  ;;  %v406_v17 = vld [vmem:[#allocation10 + $0x258] sm:$0xff] }
  0x68   :  { %567 = vmatpush.msra.mxu0 %v398_v19  ;;  %587 = vmatpush.msra.mxu1 %v494_v20  ;;  %v502_v18 = vld [vmem:[#allocation10 + $0x558] sm:$0xff]  ;;  %v407_v19 = vld [vmem:[#allocation10 + $0x260] sm:$0xff] }
  0x69   :  { %607 = vmatpush.msra.mxu2 %v399_v21  ;;  %627 = vmatpush.msra.mxu3 %v495_v22  ;;  %v503_v20 = vld [vmem:[#allocation10 + $0x560] sm:$0xff]  ;;  %v400_v21 = vld [vmem:[#allocation10 + $0x228] sm:$0xff] }
  0x6a   :  { %568 = vmatpush.msra.mxu0 %v392_v23  ;;  %588 = vmatpush.msra.mxu1 %v488_v24  ;;  %v496_v22 = vld [vmem:[#allocation10 + $0x528] sm:$0xff]  ;;  %v401_v23 = vld [vmem:[#allocation10 + $0x230] sm:$0xff] }
  0x6b   :  { %608 = vmatpush.msra.mxu2 %v393_v25  ;;  %628 = vmatpush.msra.mxu3 %v489_v26  ;;  %v497_v24 = vld [vmem:[#allocation10 + $0x530] sm:$0xff]  ;;  %v394_v25 = vld [vmem:[#allocation10 + $0x1f8] sm:$0xff] }
  0x6c   :  { %569 = vmatpush.msra.mxu0 %v386_v27  ;;  %589 = vmatpush.msra.mxu1 %v482_v28  ;;  %v490_v26 = vld [vmem:[#allocation10 + $0x4f8] sm:$0xff]  ;;  %v395_v27 = vld [vmem:[#allocation10 + $0x200] sm:$0xff] }
  0x6d   :  { %609 = vmatpush.msra.mxu2 %v387_v29  ;;  %629 = vmatpush.msra.mxu3 %v483_v30  ;;  %v491_v28 = vld [vmem:[#allocation10 + $0x500] sm:$0xff]  ;;  %v388_v29 = vld [vmem:[#allocation10 + $0x1c8] sm:$0xff] }
  0x6e   :  { %570 = vmatpush.msra.mxu0 %v380_v31  ;;  %590 = vmatpush.msra.mxu1 %v476_v32  ;;  %v484_v30 = vld [vmem:[#allocation10 + $0x4c8] sm:$0xff]  ;;  %v389_v31 = vld [vmem:[#allocation10 + $0x1d0] sm:$0xff] }
  0x6f   :  { %610 = vmatpush.msra.mxu2 %v381_v33  ;;  %630 = vmatpush.msra.mxu3 %v477_v34  ;;  %v485_v32 = vld [vmem:[#allocation10 + $0x4d0] sm:$0xff]  ;;  %v382_v33 = vld [vmem:[#allocation10 + $0x198] sm:$0xff] }
  0x70   :  { %571 = vmatpush.msra.mxu0 %v374_v35  ;;  %591 = vmatpush.msra.mxu1 %v470_v36  ;;  %v478_v34 = vld [vmem:[#allocation10 + $0x498] sm:$0xff]  ;;  %v383_v35 = vld [vmem:[#allocation10 + $0x1a0] sm:$0xff] }
  0x71   :  { %611 = vmatpush.msra.mxu2 %v375_v37  ;;  %631 = vmatpush.msra.mxu3 %v471_v38  ;;  %v479_v36 = vld [vmem:[#allocation10 + $0x4a0] sm:$0xff]  ;;  %v376_v37 = vld [vmem:[#allocation10 + $0x168] sm:$0xff] }
  0x72   :  { %572 = vmatpush.msra.mxu0 %v368_v39  ;;  %592 = vmatpush.msra.mxu1 %v464_v40  ;;  %v472_v38 = vld [vmem:[#allocation10 + $0x468] sm:$0xff]  ;;  %v377_v39 = vld [vmem:[#allocation10 + $0x170] sm:$0xff] }
  0x73   :  { %612 = vmatpush.msra.mxu2 %v369_v41  ;;  %632 = vmatpush.msra.mxu3 %v465_v42  ;;  %v473_v40 = vld [vmem:[#allocation10 + $0x470] sm:$0xff]  ;;  %v370_v41 = vld [vmem:[#allocation10 + $0x138] sm:$0xff] }
  0x74   :  { %573 = vmatpush.msra.mxu0 %v362_v43  ;;  %593 = vmatpush.msra.mxu1 %v458_v44  ;;  %v466_v42 = vld [vmem:[#allocation10 + $0x438] sm:$0xff]  ;;  %v371_v43 = vld [vmem:[#allocation10 + $0x140] sm:$0xff] }
  0x75   :  { %613 = vmatpush.msra.mxu2 %v363_v45  ;;  %633 = vmatpush.msra.mxu3 %v459_v46  ;;  %v467_v44 = vld [vmem:[#allocation10 + $0x440] sm:$0xff]  ;;  %v364_v45 = vld [vmem:[#allocation10 + $0x108] sm:$0xff] }
  0x76   :  { %574 = vmatpush.msra.mxu0 %v356_v47  ;;  %594 = vmatpush.msra.mxu1 %v452_v49  ;;  %v460_v46 = vld [vmem:[#allocation10 + $0x408] sm:$0xff]  ;;  %v365_v47 = vld [vmem:[#allocation10 + $0x110] sm:$0xff] }
  0x77   :  { %614 = vmatpush.msra.mxu2 %v357_v50  ;;  %634 = vmatpush.msra.mxu3 %v453_v51  ;;  %v461_v49 = vld [vmem:[#allocation10 + $0x410] sm:$0xff]  ;;  %v358_v50 = vld [vmem:[#allocation10 + $0xd8] sm:$0xff] }
  0x78   :  { %305 = vmatmul.f32.vlgmr.msrb.gmra.mxu0 %v1191_v48  ;;  %325 = vmatmul.f32.vlgmr.msrb.gmra.mxu1 %v1191_v48  ;;  %v333_v48 = vld [vmem:[#allocation10 + $0x10] sm:$0xff]  ;;  %v454_v51 = vld [vmem:[#allocation10 + $0x3d8] sm:$0xff] }
  0x79   :  { %575 = vmatpush.msra.mxu0 %v350_v52  ;;  %595 = vmatpush.msra.mxu1 %v446_v53  ;;  %v359_v52 = vld [vmem:[#allocation10 + $0xe0] sm:$0xff] }
  0x7a   :  { %615 = vmatpush.msra.mxu2 %v351_v54  ;;  %635 = vmatpush.msra.mxu3 %v447_v55  ;;  %v455_v53 = vld [vmem:[#allocation10 + $0x3e0] sm:$0xff]  ;;  %v352_v54 = vld [vmem:[#allocation10 + $0xa8] sm:$0xff] }
  0x7b   :  { %576 = vmatpush.msra.mxu0 %v344_v56  ;;  %596 = vmatpush.msra.mxu1 %v440_v57  ;;  %v448_v55 = vld [vmem:[#allocation10 + $0x3a8] sm:$0xff]  ;;  %v353_v56 = vld [vmem:[#allocation10 + $0xb0] sm:$0xff] }
  0x7c   :  { %616 = vmatpush.msra.mxu2 %v345_v58  ;;  %636 = vmatpush.msra.mxu3 %v441_v59  ;;  %v449_v57 = vld [vmem:[#allocation10 + $0x3b0] sm:$0xff]  ;;  %v346_v58 = vld [vmem:[#allocation10 + $0x78] sm:$0xff] }
  0x7d   :  { %577 = vmatpush.msra.mxu0 %v338_v60  ;;  %597 = vmatpush.msra.mxu1 %v434_v61  ;;  %v442_v59 = vld [vmem:[#allocation10 + $0x378] sm:$0xff]  ;;  %v347_v60 = vld [vmem:[#allocation10 + $0x80] sm:$0xff] }
  0x7e   :  { %617 = vmatpush.msra.mxu2 %v339_v62  ;;  %637 = vmatpush.msra.mxu3 %v435_v63  ;;  %v443_v61 = vld [vmem:[#allocation10 + $0x380] sm:$0xff]  ;;  %v340_v62 = vld [vmem:[#allocation10 + $0x48] sm:$0xff] }
  0x7f   :  { %578 = vmatpush.msra.mxu0 %v332_v0  ;;  %598 = vmatpush.msra.mxu1 %v428_v3  ;;  %v436_v63 = vld [vmem:[#allocation10 + $0x348] sm:$0xff]  ;;  %v341_v0 = vld [vmem:[#allocation10 + $0x50] sm:$0xff] }
  0x80   :  { %618 = vmatpush.msra.mxu2 %v333_v48  ;;  %638 = vmatpush.msra.mxu3 %v429_v4  ;;  %v437_v3 = vld [vmem:[#allocation10 + $0x350] sm:$0xff]  ;;  %v334_v48 = vld [vmem:[#allocation10 + $0x18] sm:$0xff] }
  0x81   :  { %579 = vmatmul.f32.vlgmr.msra.gmra.mxu0 %v1195_v1  ;;  %599 = vmatmul.f32.vlgmr.msra.gmra.mxu1 %v1197_v2  ;;  %v430_v4 = vld [vmem:[#allocation10 + $0x318] sm:$0xff] }
  0x82   :  { %619 = vmatmul.f32.vlgmr.msra.gmra.mxu2 %v1195_v1  ;;  %639 = vmatmul.f32.vlgmr.msra.gmra.mxu3 %v1197_v2 }
  0x83   :  { %643 = vmatpush.msrb.mxu0 %v424_v5  ;;  %663 = vmatpush.msrb.mxu1 %v520_v6  ;;  %v335_v5 = vld [vmem:[#allocation10 + $0x20] sm:$0xff] }
  0x84   :  { %683 = vmatpush.msrb.mxu2 %v425_v7  ;;  %703 = vmatpush.msrb.mxu3 %v521_v8  ;;  %v431_v6 = vld [vmem:[#allocation10 + $0x320] sm:$0xff]  ;;  %v426_v7 = vld [vmem:[#allocation10 + $0x2f8] sm:$0xff] }
  0x85   :  { %644 = vmatpush.msrb.mxu0 %v418_v9  ;;  %664 = vmatpush.msrb.mxu1 %v514_v10  ;;  %v522_v8 = vld [vmem:[#allocation10 + $0x5f8] sm:$0xff]  ;;  %v420_v9 = vld [vmem:[#allocation10 + $0x2c8] sm:$0xff] }
  0x86   :  { %684 = vmatpush.msrb.mxu2 %v419_v11  ;;  %704 = vmatpush.msrb.mxu3 %v515_v12  ;;  %v516_v10 = vld [vmem:[#allocation10 + $0x5c8] sm:$0xff]  ;;  %v414_v11 = vld [vmem:[#allocation10 + $0x298] sm:$0xff] }
  0x87   :  { %645 = vmatpush.msrb.mxu0 %v412_v13  ;;  %665 = vmatpush.msrb.mxu1 %v508_v14  ;;  %v510_v12 = vld [vmem:[#allocation10 + $0x598] sm:$0xff]  ;;  %v408_v13 = vld [vmem:[#allocation10 + $0x268] sm:$0xff] }
  0x88   :  { %685 = vmatpush.msrb.mxu2 %v413_v15  ;;  %705 = vmatpush.msrb.mxu3 %v509_v16  ;;  %v504_v14 = vld [vmem:[#allocation10 + $0x568] sm:$0xff]  ;;  %v402_v15 = vld [vmem:[#allocation10 + $0x238] sm:$0xff] }
  0x89   :  { %646 = vmatpush.msrb.mxu0 %v406_v17  ;;  %666 = vmatpush.msrb.mxu1 %v502_v18  ;;  %v498_v16 = vld [vmem:[#allocation10 + $0x538] sm:$0xff]  ;;  %v396_v17 = vld [vmem:[#allocation10 + $0x208] sm:$0xff] }
  0x8a   :  { %686 = vmatpush.msrb.mxu2 %v407_v19  ;;  %706 = vmatpush.msrb.mxu3 %v503_v20  ;;  %v492_v18 = vld [vmem:[#allocation10 + $0x508] sm:$0xff]  ;;  %v390_v19 = vld [vmem:[#allocation10 + $0x1d8] sm:$0xff] }
  0x8b   :  { %647 = vmatpush.msrb.mxu0 %v400_v21  ;;  %667 = vmatpush.msrb.mxu1 %v496_v22  ;;  %v486_v20 = vld [vmem:[#allocation10 + $0x4d8] sm:$0xff]  ;;  %v384_v21 = vld [vmem:[#allocation10 + $0x1a8] sm:$0xff] }
  0x8c   :  { %687 = vmatpush.msrb.mxu2 %v401_v23  ;;  %707 = vmatpush.msrb.mxu3 %v497_v24  ;;  %v480_v22 = vld [vmem:[#allocation10 + $0x4a8] sm:$0xff]  ;;  %v378_v23 = vld [vmem:[#allocation10 + $0x178] sm:$0xff] }
  0x8d   :  { %648 = vmatpush.msrb.mxu0 %v394_v25  ;;  %668 = vmatpush.msrb.mxu1 %v490_v26  ;;  %v474_v24 = vld [vmem:[#allocation10 + $0x478] sm:$0xff]  ;;  %v372_v25 = vld [vmem:[#allocation10 + $0x148] sm:$0xff] }
  0x8e   :  { %688 = vmatpush.msrb.mxu2 %v395_v27  ;;  %708 = vmatpush.msrb.mxu3 %v491_v28  ;;  %v468_v26 = vld [vmem:[#allocation10 + $0x448] sm:$0xff]  ;;  %v366_v27 = vld [vmem:[#allocation10 + $0x118] sm:$0xff] }
  0x8f   :  { %649 = vmatpush.msrb.mxu0 %v388_v29  ;;  %669 = vmatpush.msrb.mxu1 %v484_v30  ;;  %v462_v28 = vld [vmem:[#allocation10 + $0x418] sm:$0xff]  ;;  %v360_v29 = vld [vmem:[#allocation10 + $0xe8] sm:$0xff] }
  0x90   :  { %689 = vmatpush.msrb.mxu2 %v389_v31  ;;  %709 = vmatpush.msrb.mxu3 %v485_v32  ;;  %v456_v30 = vld [vmem:[#allocation10 + $0x3e8] sm:$0xff]  ;;  %v354_v31 = vld [vmem:[#allocation10 + $0xb8] sm:$0xff] }
  0x91   :  { %650 = vmatpush.msrb.mxu0 %v382_v33  ;;  %670 = vmatpush.msrb.mxu1 %v478_v34  ;;  %v450_v32 = vld [vmem:[#allocation10 + $0x3b8] sm:$0xff]  ;;  %v348_v33 = vld [vmem:[#allocation10 + $0x88] sm:$0xff] }
  0x92   :  { %690 = vmatpush.msrb.mxu2 %v383_v35  ;;  %710 = vmatpush.msrb.mxu3 %v479_v36  ;;  %v444_v34 = vld [vmem:[#allocation10 + $0x388] sm:$0xff]  ;;  %v342_v35 = vld [vmem:[#allocation10 + $0x58] sm:$0xff] }
  0x93   :  { %651 = vmatpush.msrb.mxu0 %v376_v37  ;;  %671 = vmatpush.msrb.mxu1 %v472_v38  ;;  %v438_v36 = vld [vmem:[#allocation10 + $0x358] sm:$0xff]  ;;  %v336_v37 = vld [vmem:[#allocation10 + $0x28] sm:$0xff] }
  0x94   :  { %691 = vmatpush.msrb.mxu2 %v377_v39  ;;  %711 = vmatpush.msrb.mxu3 %v473_v40  ;;  %v432_v38 = vld [vmem:[#allocation10 + $0x328] sm:$0xff] }
  0x95   :  { %652 = vmatpush.msrb.mxu0 %v370_v41  ;;  %672 = vmatpush.msrb.mxu1 %v466_v42 }
  0x96   :  { %692 = vmatpush.msrb.mxu2 %v371_v43  ;;  %712 = vmatpush.msrb.mxu3 %v467_v44  ;;  %v765_v44 = vld [vmem:[#allocation11] sm:$0x3] }
  0x97   :  { %653 = vmatpush.msrb.mxu0 %v364_v45  ;;  %673 = vmatpush.msrb.mxu1 %v460_v46 }
  0x98   :  { %693 = vmatpush.msrb.mxu2 %v365_v47  ;;  %713 = vmatpush.msrb.mxu3 %v461_v49  ;;  %v767_v47 = vperm.slane %v765_v44, 0 }
  0x99   :  { %654 = vmatpush.msrb.mxu0 %v358_v50  ;;  %674 = vmatpush.msrb.mxu1 %v454_v51 }
  0x9a   :  { %694 = vmatpush.msrb.mxu2 %v359_v52  ;;  %714 = vmatpush.msrb.mxu3 %v455_v53 }
  0x9b   :  { %655 = vmatpush.msrb.mxu0 %v352_v54  ;;  %675 = vmatpush.msrb.mxu1 %v448_v55 }
  0x9c   :  { %695 = vmatpush.msrb.mxu2 %v353_v56  ;;  %715 = vmatpush.msrb.mxu3 %v449_v57 }
  0x9d   :  { %656 = vmatpush.msrb.mxu0 %v346_v58  ;;  %676 = vmatpush.msrb.mxu1 %v442_v59 }
  0x9e   :  { %696 = vmatpush.msrb.mxu2 %v347_v60  ;;  %716 = vmatpush.msrb.mxu3 %v443_v61 }
  0x9f   :  { %657 = vmatpush.msrb.mxu0 %v340_v62  ;;  %677 = vmatpush.msrb.mxu1 %v436_v63 }
  0xa0   :  { %697 = vmatpush.msrb.mxu2 %v341_v0  ;;  %717 = vmatpush.msrb.mxu3 %v437_v3 }
  0xa1   :  { %658 = vmatpush.msrb.mxu0 %v334_v48  ;;  %678 = vmatpush.msrb.mxu1 %v430_v4  ;;  %v768_v48 = vperm.slane %v765_v44, 1 }
  0xa2   :  { %698 = vmatpush.msrb.mxu2 %v335_v5  ;;  %718 = vmatpush.msrb.mxu3 %v431_v6 }
  0xa3   :  { %659 = vmatmul.f32.vlgmr.msrb.gmra.mxu0 %v1195_v1  ;;  %679 = vmatmul.f32.vlgmr.msrb.gmra.mxu1 %v1197_v2 }
  0xa4   :  { %699 = vmatmul.f32.vlgmr.msrb.gmra.mxu2 %v1195_v1  ;;  %719 = vmatmul.f32.vlgmr.msrb.gmra.mxu3 %v1197_v2 }
  0xa5   :  { %723 = vmatpush.msra.mxu0 %v426_v7  ;;  %743 = vmatpush.msra.mxu1 %v522_v8 }
  0xa7   :  { %724 = vmatpush.msra.mxu0 %v420_v9  ;;  %744 = vmatpush.msra.mxu1 %v516_v10 }
  0xa9   :  { %725 = vmatpush.msra.mxu0 %v414_v11  ;;  %745 = vmatpush.msra.mxu1 %v510_v12 }
  0xab   :  { %726 = vmatpush.msra.mxu0 %v408_v13  ;;  %746 = vmatpush.msra.mxu1 %v504_v14 }
  0xad   :  { %727 = vmatpush.msra.mxu0 %v402_v15  ;;  %747 = vmatpush.msra.mxu1 %v498_v16 }
  0xaf   :  { %728 = vmatpush.msra.mxu0 %v396_v17  ;;  %748 = vmatpush.msra.mxu1 %v492_v18 }
  0xb1   :  { %729 = vmatpush.msra.mxu0 %v390_v19  ;;  %749 = vmatpush.msra.mxu1 %v486_v20  ;;  %v1219_v19 = vld [vmem:[#allocation11 + $0x6] sm:$0x3] }
  0xb3   :  { %730 = vmatpush.msra.mxu0 %v384_v21  ;;  %750 = vmatpush.msra.mxu1 %v480_v22  ;;  %v1223_v22 = vld [vmem:[#allocation11 + $0x4] sm:$0x3] }
  0xb5   :  { %731 = vmatpush.msra.mxu0 %v378_v23  ;;  %751 = vmatpush.msra.mxu1 %v474_v24 }
  0xb7   :  { %732 = vmatpush.msra.mxu0 %v372_v25  ;;  %752 = vmatpush.msra.mxu1 %v468_v26 }
  0xb9   :  { %733 = vmatpush.msra.mxu0 %v366_v27  ;;  %753 = vmatpush.msra.mxu1 %v462_v28  ;;  %v872_v27 = vperm.slane %v1219_v19, 0 }
  0xbb   :  { %734 = vmatpush.msra.mxu0 %v360_v29  ;;  %754 = vmatpush.msra.mxu1 %v456_v30 }
  0xbd   :  { %735 = vmatpush.msra.mxu0 %v354_v31  ;;  %755 = vmatpush.msra.mxu1 %v450_v32  ;;  %v863_v31 = vperm.slane %v1223_v22, 0 }
  0xbf   :  { %736 = vmatpush.msra.mxu0 %v348_v33  ;;  %756 = vmatpush.msra.mxu1 %v444_v34 }
  0xc1   :  { %737 = vmatpush.msra.mxu0 %v342_v35  ;;  %757 = vmatpush.msra.mxu1 %v438_v36 }
  0xc3   :  { %738 = vmatpush.msra.mxu0 %v336_v37  ;;  %758 = vmatpush.msra.mxu1 %v432_v38 }
  0xc4   :  { %739 = vmatmul.f32.vlgmr.msra.gmra.mxu0 %v1195_v1  ;;  %759 = vmatmul.f32.vlgmr.msra.gmra.mxu1 %v1197_v2  ;;  %v814_v1 = vld [vmem:[#allocation11 + $0x2] sm:$0x3] }
  0xc5   :  { %v816_v56 = vperm.slane %v814_v1, 0  ;;  %v817_v16 = vperm.slane %v814_v1, 1 }
  0xd8   :  { %v266_v39 = vpop.f32.mrf.mxu2  ;;  %v286_v40 = vpop.f32.mrf.mxu3 }
  0xdb   :  { %v226_v45 = vpop.f32.mrf.mxu0  ;;  %v246_v49 = vpop.f32.mrf.mxu1 }
  0xe2   :  { %v540_v41 = vpop.f32.mrf.mxu2  ;;  %v560_v42 = vpop.f32.mrf.mxu3 }
  0xe3   :  { %v561_v43 = vadd.f32 %v560_v42, %v540_v41 }
  0xe5   :  { %v763_v46 = vadd.f32 %v561_v43, %v226_v45 }
  0xe7   :  { %v771_v50 = vadd.f32 %v767_v47, %v763_v46 }
  0xe9   :  { %v914_v51 = vmul.f32 -1.442695, %v771_v50  ;;  %v884_v50 = vld [vmem:[#allocation7] sm:$0xff] }
  0xeb   :  { %929 = vpow2.f32 %v914_v51 }
  0xf1   :  { %v930_v57 = vpop.eup %929 }
  0xf2   :  { %v779_v61 = vadd.f32 1.0, %v930_v57 }
  0xf4   :  { %931 = vrcp.f32 %v779_v61  ;;  %v792_v25 = vand.u32 2147483648, %v779_v61  ;;  %vm786_vm1 = vweird.f32 %v779_v61  ;;  %v790_v26 = vand.u32 2147483647, %v779_v61 }
  0xf5   :  { %v1215_v52 = vpop.f32.mrf.mxu0  ;;  %v1217_v53 = vpop.f32.mrf.mxu1 }
  0xf6   :  { %v793_v35 = vor.u32 1.1754944e-38, %v792_v25  ;;  %vm791_vm3 = vcmp.eq.f32.partialorder %v790_v26, 8.507059e+37  ;;  %v867_v38 = vadd.f32 %v863_v31, %v1215_v52 }
  0xfa   :  { %v932_v5 = vpop.eup %931 }
  0xfb   :  { %v782_v9 = vmul.f32 %v932_v5, %v779_v61  ;;  %vm787_vm0 = vweird.f32 %v932_v5 }
  0xfc   :  { %vm788_vm2 = vmor %vm786_vm1, %vm787_vm0 }
  0xfd   :  { %v783_v10 = vsub.f32 1.0, %v782_v9 }
  0xfe   :  { %v580_v58 = vpop.f32.mrf.mxu0  ;;  %v600_v59 = vpop.f32.mrf.mxu1 }
  0xff   :  { %v601_v63 = vadd.f32 %v600_v59, %v580_v58  ;;  %v784_v13 = vmul.f32 %v932_v5, %v783_v10 }
 0x101   :  { %v764_v3 = vadd.f32 %v601_v63, %v246_v49  ;;  %v785_v21 = vadd.f32 %v932_v5, %v784_v13 }
 0x103   :  { %v772_v4 = vadd.f32 %v768_v48, %v764_v3  ;;  %v789_v33 = vsel %vm788_vm2, %v932_v5, %v785_v21 }
 0x104   :  { %v794_v37 = vsel %vm791_vm3, %v793_v35, %v789_v33 }
 0x105   :  { %v620_v54 = vpop.f32.mrf.mxu2  ;;  %v640_v2 = vpop.f32.mrf.mxu3  ;;  %v915_v7 = vmul.f32 -1.442695, %v772_v4  ;;  %v864_v4 = vperm.slane %v1223_v22, 1 }
 0x106   :  { %v641_v55 = vadd.f32 %v640_v2, %v620_v54 }
 0x108   :  { %v811_v60 = vadd.f32 %v641_v55, %v266_v39 }
 0x10a   :  { %v820_v62 = vadd.f32 %v816_v56, %v811_v60 }
 0x10c   :  { %v916_v0 = vmul.f32 -1.442695, %v820_v62 }
 0x10e   :  { %933 = vpow2.f32 %v916_v0  ;;  %v873_v0 = vperm.slane %v1219_v19, 1 }
 0x10f   :  { %935 = vpow2.f32 %v915_v7 }
 0x114   :  { %v934_v6 = vpop.eup %933 }
 0x115   :  { %v828_v8 = vadd.f32 1.0, %v934_v6  ;;  %v936_v14 = vpop.eup %935 }
 0x116   :  { %v1221_v20 = vadd.f32 1.0, %v936_v14 }
 0x117   :  { %937 = vrcp.f32 %v828_v8  ;;  %v841_v47 = vand.u32 2147483648, %v828_v8  ;;  %vm835_vm5 = vweird.f32 %v828_v8  ;;  %v839_v49 = vand.u32 2147483647, %v828_v8 }
 0x118   :  { %939 = vrcp.f32 %v1221_v20  ;;  %v807_v62 = vand.u32 2147483648, %v1221_v20  ;;  %vm801_vm9 = vweird.f32 %v1221_v20  ;;  %v805_v63 = vand.u32 2147483647, %v1221_v20 }
 0x119   :  { %v842_v54 = vor.u32 1.1754944e-38, %v841_v47  ;;  %vm840_vm7 = vcmp.eq.f32.partialorder %v839_v49, 8.507059e+37 }
 0x11a   :  { %vm806_vm11 = vcmp.eq.f32.partialorder %v805_v63, 8.507059e+37 }
 0x11d   :  { %v938_v17 = vpop.eup %937 }
 0x11e   :  { %v831_v23 = vmul.f32 %v938_v17, %v828_v8  ;;  %v940_v41 = vpop.eup %939  ;;  %vm836_vm4 = vweird.f32 %v938_v17  ;;  %v808_v8 = vor.u32 1.1754944e-38, %v807_v62 }
 0x11f   :  { %v797_v46 = vmul.f32 %v940_v41, %v1221_v20  ;;  %vm837_vm6 = vmor %vm835_vm5, %vm836_vm4  ;;  %vm802_vm8 = vweird.f32 %v940_v41 }
 0x120   :  { %v660_v11 = vpop.f32.mrf.mxu0  ;;  %v680_v12 = vpop.f32.mrf.mxu1  ;;  %v832_v34 = vsub.f32 1.0, %v831_v23  ;;  %vm803_vm10 = vmor %vm801_vm9, %vm802_vm8 }
 0x121   :  { %v681_v15 = vadd.f32 %v680_v12, %v660_v11  ;;  %v798_v52 = vsub.f32 1.0, %v797_v46  ;;  %v868_v11 = vadd.f32 %v864_v4, %v1217_v53 }
 0x123   :  { %v812_v18 = vadd.f32 %v681_v15, %v286_v40  ;;  %v833_v40 = vmul.f32 %v938_v17, %v832_v34  ;;  %v799_v57 = vmul.f32 %v940_v41, %v798_v52 }
 0x125   :  { %v821_v24 = vadd.f32 %v817_v16, %v812_v18  ;;  %v834_v44 = vadd.f32 %v938_v17, %v833_v40  ;;  %v800_v60 = vadd.f32 %v940_v41, %v799_v57  ;;  %v885_v18 = vld [vmem:[#allocation7 + $0x8] sm:$0xff] }
 0x127   :  { %v917_v28 = vmul.f32 -1.442695, %v821_v24  ;;  %v700_v29 = vpop.f32.mrf.mxu2  ;;  %v720_v30 = vpop.f32.mrf.mxu3  ;;  %v838_v51 = vsel %vm837_vm6, %v938_v17, %v834_v44  ;;  %v804_v6 = vsel %vm803_vm10, %v940_v41, %v800_v60 }
 0x128   :  { %v721_v32 = vadd.f32 %v720_v30, %v700_v29  ;;  %v843_v55 = vsel %vm840_vm7, %v842_v54, %v838_v51  ;;  %v809_v10 = vsel %vm806_vm11, %v808_v8, %v804_v6 }
 0x129   :  { %941 = vpow2.f32 %v917_v28 }
 0x12a   :  { %v876_v36 = vadd.f32 %v872_v27, %v721_v32 }
 0x12c   :  { %v878_v39 = vmul.f32 %v876_v36, %v794_v37 }
 0x12e   :  { %v880_v42 = vadd.f32 %v878_v39, %v867_v38 }
 0x12f   :  { %v942_v43 = vpop.eup %941 }
 0x130   :  { %943 = vtanh.f32 %v880_v42  ;;  %v829_v45 = vadd.f32 1.0, %v942_v43 }
 0x132   :  { %945 = vrcp.f32 %v829_v45  ;;  %v856_v16 = vand.u32 2147483648, %v829_v45  ;;  %vm850_vm13 = vweird.f32 %v829_v45  ;;  %v854_v17 = vand.u32 2147483647, %v829_v45 }
 0x134   :  { %v857_v21 = vor.u32 1.1754944e-38, %v856_v16  ;;  %vm855_vm15 = vcmp.eq.f32.partialorder %v854_v17, 8.507059e+37 }
 0x136   :  { %v944_v1 = vpop.eup %943 }
 0x137   :  { %v886_v2 = vsub.f32 %v884_v50, %v944_v1 }
 0x138   :  { %v946_v59 = vpop.eup %945 }
 0x139   :  { %v888_v56 = vmul.f32 %v886_v2, %v843_v55  ;;  %v846_v61 = vmul.f32 %v946_v59, %v829_v45  ;;  %vm851_vm12 = vweird.f32 %v946_v59 }
 0x13a   :  { %vm852_vm14 = vmor %vm850_vm13, %vm851_vm12 }
 0x13b   :  { %v890_v58 = vadd.f32 %v944_v1, %v888_v56  ;;  %v847_v7 = vsub.f32 1.0, %v846_v61 }
 0x13d   :  { %892 = vst [vmem:[#allocation13] sm:$0xff] %v890_v58  ;;  %v848_v13 = vmul.f32 %v946_v59, %v847_v7 }
 0x13f   :  { %v849_v15 = vadd.f32 %v946_v59, %v848_v13 }
 0x141   :  { %v740_v3 = vpop.f32.mrf.mxu0  ;;  %v760_v48 = vpop.f32.mrf.mxu1  ;;  %v853_v19 = vsel %vm852_vm14, %v946_v59, %v849_v15 }
 0x142   :  { %v761_v5 = vadd.f32 %v760_v48, %v740_v3  ;;  %v858_v23 = vsel %vm855_vm15, %v857_v21, %v853_v19 }
 0x144   :  { %v877_v9 = vadd.f32 %v873_v0, %v761_v5 }
 0x146   :  { %v879_v12 = vmul.f32 %v877_v9, %v809_v10 }
 0x148   :  { %v881_v14 = vadd.f32 %v879_v12, %v868_v11 }
 0x14a   :  { %947 = vtanh.f32 %v881_v14 }
 0x150   :  { %v948_v20 = vpop.eup %947 }
 0x151   :  { %v887_v22 = vsub.f32 %v885_v18, %v948_v20 }
 0x153   :  { %v889_v53 = vmul.f32 %v887_v22, %v858_v23 }
 0x155   :  { %v891_v24 = vadd.f32 %v948_v20, %v889_v53 }
 0x157   :  { %893 = vst [vmem:[#allocation13 + $0x8] sm:$0xff] %v891_v24 }
 0x158   :  { %904 = dma.vmem_to_hbm [thread:$0]  %s900_s5, 256, %s902_s29, [#allocation4]  }
 0x159   :  { %1125 = dma.done.wait [#allocation4], 256  }
 0x15a   :  { %1126 = vsyncadd [#allocation4], 4294967040 }
 0x15b   :  { %909 = vsyncpa [#allocation3], 1 }
 0x15c   :  { %910 = vsyncpa [#allocation6], 1 }
 0x15d   :  { %911 = vsyncpa [#allocation9], 1 }
 0x15e   :  { %912 = vsyncpa [#allocation12], 1 }
 0x15f   :  { %913 = vsyncpa [#allocation4], 1 }

</bundles_post_ra>
